<compile_context>
chip_gen: v6e
topology: v6e:2x2x1
jax: 0.10.0
libtpu: 0.0.40
codegen_flags: <defaults>
</compile_context>

<pallas_src>
import functools

import jax
import jax.numpy as jnp
from jax.experimental import pallas as pl
from jax.experimental.pallas import tpu as pltpu

LANE = 128
SUBLANE = 8
MAX_TILE_ROWS = 1024  # (1024,128) f32 block = 512 KiB; 2 inputs x 2 bufs = 2 MiB VMEM


def _sse_kernel(a_ref, b_ref, out_ref, acc_ref, *, tm, m_rows, nb_per, needs_mask):
    """Accumulate sum((a-b)^2) per split into a VMEM (8,128) accumulator."""
    p = pl.program_id(0)   # split (parallel across TensorCores on v7x)
    j = pl.program_id(1)   # row-tile reduction step

    @pl.when(j == 0)
    def _():
        acc_ref[...] = jnp.zeros_like(acc_ref)

    a = a_ref[...]
    b = b_ref[...]
    if a.dtype != jnp.float32:  # only cast when inputs are not already f32
        a = a.astype(jnp.float32)
        b = b.astype(jnp.float32)
    d = a - b
    sq = d * d

    if needs_mask:
        # Logical (unclamped) block index -> global row offsets; zero rows past
        # the valid range (ragged last block / fully-out-of-range blocks).
        lb = p * nb_per + j
        row_ids = lb * tm + jax.lax.broadcasted_iota(jnp.int32, (tm, LANE), 0)
        sq = jnp.where(row_ids < m_rows, sq, 0.0)

    # VPU-only partial reduction: fold the (tm,128) tile into one (8,128) vreg.
    acc_ref[...] += jnp.sum(sq.reshape(tm // SUBLANE, SUBLANE, LANE), axis=0)

    @pl.when(j == nb_per - 1)
    def _():
        # Single cross-sublane reduce per split, deferred to the last step.
        out_ref[...] = jnp.sum(acc_ref[...], axis=0, keepdims=True)


def stn_warp(i, f):
    # TODO(synk): STN in the reference is an unimplemented stub that returns
    # its input unchanged; reproduce that identity behavior here.
    del f
    return i


def _round_up(x, n):
    return ((x + n - 1) // n) * n


def pixel_loss(f1, i1, igt):
    """mean((STN(i1, f1) - igt)**2) == mean((i1 - igt)**2)."""
    new_i = stn_warp(i1, f1)

    a = new_i.reshape(-1)
    b = igt.reshape(-1)
    n_elems = a.shape[0]

    # Handle a lane-tail (< 128 elements) in plain JAX -> no full-array pad.
    n_main = (n_elems // LANE) * LANE
    if n_main != n_elems:
        tail_sum = jnp.sum(
            (a[n_main:].astype(jnp.float32) - b[n_main:].astype(jnp.float32)) ** 2
        )
        a_main, b_main = a[:n_main], b[:n_main]
    else:
        tail_sum = jnp.float32(0.0)
        a_main, b_main = a, b

    if n_main == 0:
        return tail_sum / jnp.float32(n_elems)

    a2 = a_main.reshape(-1, LANE)
    b2 = b_main.reshape(-1, LANE)
    m = a2.shape[0]

    # Fixed large tile; granularity matches sublane packing of the dtype.
    itemsize = int(jnp.dtype(a2.dtype).itemsize)
    granule = {4: SUBLANE, 2: 16, 1: 32}.get(itemsize, SUBLANE)
    tm = min(MAX_TILE_ROWS, _round_up(m, granule))
    nb = pl.cdiv(m, tm)

    # Shard row tiles across TensorCores (megacore on v7x; serial elsewhere).
    n_splits = 2 if nb >= 2 else 1
    nb_per = pl.cdiv(nb, n_splits)
    needs_mask = (m % tm != 0) or (n_splits * nb_per != nb)

    kernel = functools.partial(
        _sse_kernel, tm=tm, m_rows=m, nb_per=nb_per, needs_mask=needs_mask
    )

    def in_map(p, j):
        # Clamp so a fully-out-of-range logical block never DMAs past the
        # array; its contribution is masked to zero inside the kernel.
        return (jnp.minimum(p * nb_per + j, nb - 1), 0)

    partials = pl.pallas_call(
        kernel,
        out_shape=jax.ShapeDtypeStruct((n_splits, LANE), jnp.float32),
        grid_spec=pltpu.PrefetchScalarGridSpec(
            num_scalar_prefetch=0,
            grid=(n_splits, nb_per),
            in_specs=[
                pl.BlockSpec((tm, LANE), in_map),
                pl.BlockSpec((tm, LANE), in_map),
            ],
            out_specs=pl.BlockSpec((1, LANE), lambda p, j: (p, 0)),
            scratch_shapes=[pltpu.VMEM((SUBLANE, LANE), jnp.float32)],
        ),
        compiler_params=pltpu.CompilerParams(
            dimension_semantics=("parallel", "arbitrary"),
        ),
        cost_estimate=pl.CostEstimate(
            flops=3 * n_elems,
            transcendentals=0,
            bytes_accessed=2 * n_elems * itemsize,
        ),
    )(a2, b2)

    total = jnp.sum(partials) + tail_sum
    return total / jnp.float32(n_elems)


if __name__ == "__main__":
    key = jax.random.PRNGKey(0)
    k1, k2, k3 = jax.random.split(key, 3)

    B, C, H, W = 2, 4, 16, 16
    # f1: a dummy "flow/feature" tensor (unused by the identity STN stub).
    f1 = jax.random.normal(k1, (B, 2, H, W), dtype=jnp.float32)
    i1 = jax.random.normal(k2, (B, C, H, W), dtype=jnp.float32)
    igt = jax.random.normal(k3, (B, C, H, W), dtype=jnp.float32)

    loss_fn = jax.jit(pixel_loss)
    loss = jax.block_until_ready(loss_fn(f1, i1, igt))

    # Reference check in plain JAX.
    ref = jnp.mean((i1 - igt) ** 2)
    assert jnp.allclose(loss, ref, rtol=1e-5, atol=1e-6), (loss, ref)

    print("KERNEL_OK")
</pallas_src>

<mosaic_0001>
module attributes {stable_mosaic.version = 11 : i64} {
  func.func @_sse_kernel(%arg0: i32, %arg1: i32, %arg2: memref<16x128xf32, #tpu.memory_space<vmem>>, %arg3: memref<16x128xf32, #tpu.memory_space<vmem>>, %arg4: memref<1x128xf32, #tpu.memory_space<vmem>>, %arg5: memref<8x128xf32, #tpu.memory_space<vmem>>) attributes {dimension_semantics = [#tpu.dimension_semantics<parallel>, #tpu.dimension_semantics<arbitrary>], iteration_bounds = array<i64: 1, 1>, scalar_prefetch = 0 : i64, scratch_operands = 1 : i64, tpu.core_type = #tpu.core_type<tc>, window_params = [{transform_indices = @transform_0, window_bounds = array<i64: 16, 128>}, {transform_indices = @transform_1, window_bounds = array<i64: 16, 128>}, {transform_indices = @transform_2, window_bounds = array<i64: 1, 128>}]} {
    %c0_i32 = arith.constant 0 : i32
    %0 = arith.cmpi eq, %arg1, %c0_i32 : i32
    %1 = arith.extui %0 : i1 to i32
    %c0_i32_0 = arith.constant 0 : i32
    %2 = arith.cmpi ne, %1, %c0_i32_0 : i32
    scf.if %2 {
      %cst_10 = arith.constant 0.000000e+00 : f32
      %15 = vector.broadcast %cst_10 : f32 to vector<8x128xf32>
      %c0_11 = arith.constant 0 : index
      %c0_12 = arith.constant 0 : index
      %16 = vector.load %arg5[%c0_11, %c0_12] : memref<8x128xf32, #tpu.memory_space<vmem>>, vector<8x128xf32>
      tpu.vector_store %arg5[%c0_11, %c0_12], %15 {strides = array<i32>} : memref<8x128xf32, #tpu.memory_space<vmem>>, vector<8x128xf32>,
    } else {
    }
    %c0 = arith.constant 0 : index
    %c0_1 = arith.constant 0 : index
    %3 = vector.load %arg2[%c0, %c0_1] : memref<16x128xf32, #tpu.memory_space<vmem>>, vector<16x128xf32>
    %c0_2 = arith.constant 0 : index
    %c0_3 = arith.constant 0 : index
    %4 = vector.load %arg3[%c0_2, %c0_3] : memref<16x128xf32, #tpu.memory_space<vmem>>, vector<16x128xf32>
    %5 = arith.subf %3, %4 : vector<16x128xf32>
    %6 = arith.mulf %5, %5 : vector<16x128xf32>
    %c0_4 = arith.constant 0 : index
    %c0_5 = arith.constant 0 : index
    %7 = vector.load %arg5[%c0_4, %c0_5] : memref<8x128xf32, #tpu.memory_space<vmem>>, vector<8x128xf32>
    %8 = vector.shape_cast %6 : vector<16x128xf32> to vector<2x8x128xf32>
    %cst = arith.constant dense<0.000000e+00> : vector<8x128xf32>
    %9 = vector.multi_reduction <add>, %8, %cst [0] : vector<2x8x128xf32> to vector<8x128xf32>
    %10 = arith.addf %7, %9 : vector<8x128xf32>
    %c0_6 = arith.constant 0 : index
    %c0_7 = arith.constant 0 : index
    %11 = vector.load %arg5[%c0_6, %c0_7] : memref<8x128xf32, #tpu.memory_space<vmem>>, vector<8x128xf32>
    tpu.vector_store %arg5[%c0_6, %c0_7], %10 {strides = array<i32>} : memref<8x128xf32, #tpu.memory_space<vmem>>, vector<8x128xf32>,
    %c0_i32_8 = arith.constant 0 : i32
    %12 = arith.cmpi eq, %arg1, %c0_i32_8 : i32
    %13 = arith.extui %12 : i1 to i32
    %c0_i32_9 = arith.constant 0 : i32
    %14 = arith.cmpi ne, %13, %c0_i32_9 : i32
    scf.if %14 {
      %c0_10 = arith.constant 0 : index
      %c0_11 = arith.constant 0 : index
      %15 = vector.load %arg5[%c0_10, %c0_11] : memref<8x128xf32, #tpu.memory_space<vmem>>, vector<8x128xf32>
      %cst_12 = arith.constant dense<0.000000e+00> : vector<128xf32>
      %16 = vector.multi_reduction <add>, %15, %cst_12 [0] : vector<8x128xf32> to vector<128xf32>
      %17 = vector.shape_cast %16 : vector<128xf32> to vector<1x128xf32>
      %c0_13 = arith.constant 0 : index
      %c0_14 = arith.constant 0 : index
      %18 = vector.load %arg4[%c0_13, %c0_14] : memref<1x128xf32, #tpu.memory_space<vmem>>, vector<1x128xf32>
      tpu.vector_store %arg4[%c0_13, %c0_14], %17 {strides = array<i32>} : memref<1x128xf32, #tpu.memory_space<vmem>>, vector<1x128xf32>,
    } else {
    }
    return
  }
  func.func @transform_0(%arg0: i32, %arg1: i32) -> (i32, i32) {
    %c1_i32 = arith.constant 1 : i32
    %0 = arith.muli %arg0, %c1_i32 : i32
    %1 = arith.addi %0, %arg1 : i32
    %c0_i32 = arith.constant 0 : i32
    %2 = arith.minsi %1, %c0_i32 : i32
    %c0_i32_0 = arith.constant 0 : i32
    %c0_i32_1 = arith.constant 0 : i32
    return %2, %c0_i32_0 : i32, i32
  }
  func.func @transform_1(%arg0: i32, %arg1: i32) -> (i32, i32) {
    %c1_i32 = arith.constant 1 : i32
    %0 = arith.muli %arg0, %c1_i32 : i32
    %1 = arith.addi %0, %arg1 : i32
    %c0_i32 = arith.constant 0 : i32
    %2 = arith.minsi %1, %c0_i32 : i32
    %c0_i32_0 = arith.constant 0 : i32
    %c0_i32_1 = arith.constant 0 : i32
    return %2, %c0_i32_0 : i32, i32
  }
  func.func @transform_2(%arg0: i32, %arg1: i32) -> (i32, i32) {
    %c0_i32 = arith.constant 0 : i32
    %c0_i32_0 = arith.constant 0 : i32
    return %arg0, %c0_i32 : i32, i32
  }
}

</mosaic_0001>

<bundles_post_ra>
// kernel: pixel_loss.1
= control target key start
LH: loop header
LB: loop body
LE: loop exit
PB: predicated region body
PF: predicated region fallthrough
CT: control target
= control target key end

     0   :  { %s149_s0 = inlined_call_operand.vmem [shape: f32[16,128], index: 0, kind: input, shape index: {}]   ;;  %s150_s1 = inlined_call_operand.vmem [shape: f32[16,128], index: 1, kind: input, shape index: {}]   ;;  %s151_s2 = inlined_call_operand.vmem [shape: f32[1,128], index: 2, kind: output, shape index: {}]  }
   0x1   :  { %v80_v0 = vld [vmem:[%s149_s0] sm:$0xff]  ;;  %v81_v1 = vld [vmem:[%s149_s0 + $0x8] sm:$0xff] }
   0x2   :  { %v82_v2 = vld [vmem:[%s150_s1] sm:$0xff]  ;;  %v83_v3 = vld [vmem:[%s150_s1 + $0x8] sm:$0xff] }
   0x3   :  { %v84_v4 = vsub.f32 %v80_v0, %v82_v2  ;;  %v85_v5 = vsub.f32 %v81_v1, %v83_v3 }
   0x5   :  { %v86_v6 = vmul.f32 %v84_v4, %v84_v4  ;;  %v87_v7 = vmul.f32 %v85_v5, %v85_v5 }
   0x7   :  { %v89_v8 = vadd.f32 %v87_v7, %v86_v6 }
   0x9   :  { %v96_v9 = vrot.slane %v89_v8, 4 }
   0xb   :  { %v97_v10 = vadd.f32 %v96_v9, %v89_v8 }
   0xd   :  { %v98_v11 = vrot.slane %v97_v10, 2 }
   0xf   :  { %v99_v12 = vadd.f32 %v98_v11, %v97_v10 }
  0x11   :  { %v100_v13 = vrot.slane %v99_v12, 1 }
  0x13   :  { %v101_v14 = vadd.f32 %v100_v13, %v99_v12 }
  0x15   :  { %102 = vst [vmem:[%s151_s2] sm:$0x1] %v101_v14 }

</bundles_post_ra>
